<compile_context>
chip_gen: v7x
topology: tpu7x:2x2x1
jax: 0.10.0
libtpu: 0.0.40
codegen_flags: <defaults>
</compile_context>

<pallas_src>
import jax
import jax.numpy as jnp
from jax.experimental import pallas as pl
from jax.experimental.pallas import tpu as pltpu


# ----------------------------------------------------------------------------
# Kernels
# ----------------------------------------------------------------------------
def _res_fc_fused_kernel(x_ref, w1_ref, b1_ref, w2_ref, b2_ref, o_ref):
    """(x @ W1 + b1) -> ReLU -> (@ W2 + b2) on one batch tile.

    Both weight matrices are fully resident in VMEM; the intermediate
    activation h never leaves VMEM/vregs.
      x:(tb,D_in) bf16   w1:(D_in,D_mid) bf16   b1:(1,D_mid) f32
      w2:(D_mid,D_out) bf16   b2:(1,D_out) f32  o:(tb,D_out)
    """
    h = jnp.dot(x_ref[...], w1_ref[...], preferred_element_type=jnp.float32)
    h = jnp.maximum(h + b1_ref[...], 0.0)                   # f32 bias + ReLU (VPU)
    y = jnp.dot(h.astype(w2_ref.dtype), w2_ref[...],
                preferred_element_type=jnp.float32) + b2_ref[...]
    o_ref[...] = y.astype(o_ref.dtype)


def _res_fc_ktiled_kernel(x_ref, w1_ref, b1_ref, w2_ref, b2_ref, o_ref, acc_ref):
    """Scaling path (large dim): W1 streamed along K into an f32 accumulator
    (P3 pattern); ReLU + second matmul run once at the last K step.
    grid = (batch_tiles, k_tiles), k innermost ("arbitrary")."""
    k = pl.program_id(1)

    @pl.when(k == 0)
    def _():
        acc_ref[...] = jnp.zeros_like(acc_ref)

    acc_ref[...] += jnp.dot(x_ref[...], w1_ref[...],
                            preferred_element_type=jnp.float32)

    @pl.when(k == pl.num_programs(1) - 1)
    def _():
        h = jnp.maximum(acc_ref[...] + b1_ref[...], 0.0)    # f32 epilogue
        y = jnp.dot(h.astype(w2_ref.dtype), w2_ref[...],
                    preferred_element_type=jnp.float32) + b2_ref[...]
        o_ref[...] = y.astype(o_ref.dtype)


# ----------------------------------------------------------------------------
# Tiling / spec helpers
# ----------------------------------------------------------------------------
def _round_up(x, m):
    return ((x + m - 1) // m) * m


def _pick_tb(Bp, tb_max):
    """Batch tile: sublane multiple, <= Bp, >= 2 grid steps whenever Bp >= 16
    (so v7x megacore can shard the 'parallel' batch axis), 128/256-multiples
    once the batch is large enough to matter for MXU M-utilization."""
    if Bp < 16:
        return 8
    half = pl.cdiv(Bp, 2)
    if Bp <= tb_max:
        if half >= 128:
            return max(8, min((tb_max // 8) * 8, _round_up(half, 128)))
        return _round_up(half, 8)
    # Large batch: as big as allowed, preferably a 256-multiple
    # (v6e HBM-roofline measurements: >=512-wide tiles ~85%).
    if tb_max >= 256:
        return (tb_max // 256) * 256
    return max(8, (tb_max // 8) * 8)


def _pick_tk(D_in, tk):
    """K tile for the scaling path: must divide D_in exactly (no garbage in the
    reduction) and be a 128-multiple (lane-dense x block) or the full D_in."""
    if tk is not None:
        assert D_in % tk == 0 and (tk % 128 == 0 or tk == D_in), tk
        return tk
    for cand in (1024, 512, 256, 128):
        if D_in % cand == 0:
            return cand
    return D_in  # odd dim (dim*64 not a 128-multiple): single K step


def _weight_spec(shape, index_map, single_buffer):
    """BlockSpec for a grid-invariant operand.  Single-buffering halves its
    resident VMEM (Pallas already skips the re-DMA for a constant block index
    but would otherwise still allocate two buffers)."""
    if single_buffer:
        return pl.BlockSpec(shape, index_map, pipeline_mode=pl.Buffered(1))
    return pl.BlockSpec(shape, index_map)


def _fused_resident_bytes(tb, D_in, D_mid, D_out, w_itemsize, wbuf):
    weights = w_itemsize * (D_in * D_mid + D_mid * D_out) * wbuf
    biases = 4 * (D_mid + D_out) * wbuf
    io = 2 * tb * D_in * 2 + 2 * tb * D_out * 4
    interm = 4 * tb * D_mid
    return weights + biases + io + interm


def _ktiled_resident_bytes(tb, tk, D_mid, D_out, w_itemsize, wbuf):
    w1_stream = 2 * w_itemsize * tk * D_mid          # W1 K-slices, double buffered
    w2_res = w_itemsize * D_mid * D_out * wbuf
    biases = 4 * (D_mid + D_out) * wbuf
    io = 2 * tb * tk * 2 + 2 * tb * D_out * 4
    acc = 4 * tb * D_mid
    return w1_stream + w2_res + biases + io + acc


# ----------------------------------------------------------------------------
# pallas_call builders
# ----------------------------------------------------------------------------
def _call_fused(xb, w1, b1, w2, b2, *, tb, out_dtype, single_buffer, cost, vmem_limit):
    Bp, D_in = xb.shape
    D_mid, D_out = w1.shape[1], w2.shape[1]
    cp = dict(dimension_semantics=("parallel",))
    if vmem_limit is not None:
        cp["vmem_limit_bytes"] = vmem_limit
    return pl.pallas_call(
        _res_fc_fused_kernel,
        out_shape=jax.ShapeDtypeStruct((Bp, D_out), out_dtype),
        grid_spec=pltpu.PrefetchScalarGridSpec(
            num_scalar_prefetch=0,
            grid=(pl.cdiv(Bp, tb),),
            in_specs=[
                pl.BlockSpec((tb, D_in), lambda i: (i, 0)),
                _weight_spec((D_in, D_mid), lambda i: (0, 0), single_buffer),
                _weight_spec((1, D_mid), lambda i: (0, 0), single_buffer),
                _weight_spec((D_mid, D_out), lambda i: (0, 0), single_buffer),
                _weight_spec((1, D_out), lambda i: (0, 0), single_buffer),
            ],
            out_specs=pl.BlockSpec((tb, D_out), lambda i: (i, 0)),
        ),
        compiler_params=pltpu.CompilerParams(**cp),
        cost_estimate=cost,
    )(xb, w1, b1, w2, b2)


def _call_ktiled(xb, w1, b1, w2, b2, *, tb, tk, out_dtype, single_buffer, cost,
                 vmem_limit):
    Bp, D_in = xb.shape
    D_mid, D_out = w1.shape[1], w2.shape[1]
    cp = dict(dimension_semantics=("parallel", "arbitrary"))
    if vmem_limit is not None:
        cp["vmem_limit_bytes"] = vmem_limit
    # TODO(synk): also tile D_mid / D_out when W2 alone no longer fits VMEM.
    return pl.pallas_call(
        _res_fc_ktiled_kernel,
        out_shape=jax.ShapeDtypeStruct((Bp, D_out), out_dtype),
        grid_spec=pltpu.PrefetchScalarGridSpec(
            num_scalar_prefetch=0,
            grid=(pl.cdiv(Bp, tb), pl.cdiv(D_in, tk)),
            in_specs=[
                pl.BlockSpec((tb, tk), lambda i, k: (i, k)),
                pl.BlockSpec((tk, D_mid), lambda i, k: (k, 0)),  # streamed along K
                _weight_spec((1, D_mid), lambda i, k: (0, 0), single_buffer),
                _weight_spec((D_mid, D_out), lambda i, k: (0, 0), single_buffer),
                _weight_spec((1, D_out), lambda i, k: (0, 0), single_buffer),
            ],
            out_specs=pl.BlockSpec((tb, D_out), lambda i, k: (i, 0)),
            scratch_shapes=[pltpu.VMEM((tb, D_mid), jnp.float32)],
        ),
        compiler_params=pltpu.CompilerParams(**cp),
        cost_estimate=cost,
    )(xb, w1, b1, w2, b2)


# ----------------------------------------------------------------------------
# Public API
# ----------------------------------------------------------------------------
def prepare_params(w1_torch, b1_torch, w2_torch, b2_torch):
    """Convert PyTorch nn.Linear params (weight:(out,in), bias:(out,)) to the
    kernel layout: weights (in,out) in bf16 (MXU operands), biases (1,out) f32."""
    return {
        "w1": jnp.asarray(w1_torch).T.astype(jnp.bfloat16),
        "b1": jnp.asarray(b1_torch).reshape(1, -1).astype(jnp.float32),
        "w2": jnp.asarray(w2_torch).T.astype(jnp.bfloat16),
        "b2": jnp.asarray(b2_torch).reshape(1, -1).astype(jnp.float32),
    }


def res_fc_forward(x, params, *, tb_max=512, tk=None,
                   vmem_budget_bytes=24 * 1024 * 1024):
    """RES_FC.forward: Linear(dim*64, dim_out*64) -> ReLU -> Linear, fused."""
    B, D_in = x.shape
    w1, b1, w2, b2 = params["w1"], params["b1"], params["w2"], params["b2"]
    assert w1.shape[0] == D_in, (w1.shape, D_in)
    D_mid, D_out = w1.shape[1], w2.shape[1]
    out_dtype = x.dtype

    # MXU operands in bf16 (halves x's HBM bytes, full-rate MXU); accumulation
    # stays f32 via preferred_element_type inside the kernel.
    xb = x.astype(jnp.bfloat16)

    # Only pad tiny batches to one sublane (8 rows).  Larger batches rely on
    # Pallas' partial-last-block handling (padded rows are garbage after the
    # matmuls but are never written back; we also slice to B below).
    pad = 8 - B if B < 8 else 0
    if pad:
        xb = jnp.pad(xb, ((0, pad), (0, 0)))
    Bp = B + pad

    tb = _pick_tb(Bp, tb_max)
    tk_sel = _pick_tk(D_in, tk)

    cost = pl.CostEstimate(
        flops=2 * B * D_in * D_mid + 2 * B * D_mid * D_out,
        transcendentals=0,
        bytes_accessed=int(
            xb.size * xb.dtype.itemsize
            + w1.size * w1.dtype.itemsize + w2.size * w2.dtype.itemsize
            + b1.size * b1.dtype.itemsize + b2.size * b2.dtype.itemsize
            + B * D_out * jnp.dtype(out_dtype).itemsize),
    )

    use_fused = _fused_resident_bytes(
        tb, D_in, D_mid, D_out, w1.dtype.itemsize, wbuf=1) <= vmem_budget_bytes

    def impl(single_buffer):
        wbuf = 1 if single_buffer else 2
        if use_fused:
            est = _fused_resident_bytes(tb, D_in, D_mid, D_out,
                                        w1.dtype.itemsize, wbuf)
        else:
            est = _ktiled_resident_bytes(tb, tk_sel, D_mid, D_out,
                                         w1.dtype.itemsize, wbuf)
        vmem_limit = None
        if est > 28 * 1024 * 1024:
            # Raise the scoped-VMEM limit explicitly; cap at v7x physical 64 MiB.
            vmem_limit = min(int(est * 1.5) + (4 << 20), 64 * 1024 * 1024)
        if use_fused:
            return _call_fused(xb, w1, b1, w2, b2, tb=tb, out_dtype=out_dtype,
                               single_buffer=single_buffer, cost=cost,
                               vmem_limit=vmem_limit)
        return _call_ktiled(xb, w1, b1, w2, b2, tb=tb, tk=tk_sel,
                            out_dtype=out_dtype, single_buffer=single_buffer,
                            cost=cost, vmem_limit=vmem_limit)

    try:
        out = impl(single_buffer=True)     # single-buffered resident weights
    except Exception:                      # pipeline_mode / Buffered(1) unsupported
        out = impl(single_buffer=False)    # fall back to default double buffering

    return out[:B] if pad else out


def _reference_forward(x, params):
    """Pure-JAX reference mirroring nn.Linear -> ReLU -> nn.Linear (f32 math,
    using the same bf16-stored weights upcast to f32)."""
    w1 = params["w1"].astype(jnp.float32)
    w2 = params["w2"].astype(jnp.float32)
    h = jnp.maximum(x.astype(jnp.float32) @ w1 + params["b1"][0], 0.0)
    return h @ w2 + params["b2"][0]


if __name__ == "__main__":
    # RES_FC(dim=4, dim_out=4, dim_in=8, 'zero', InstanceNorm2d, False, True)
    #   -> Linear(256, 256) -> ReLU -> Linear(256, 256); dim_in & friends unused.
    B, dim, dim_out = 2, 4, 4
    D_in, D_mid, D_out = dim * 64, dim_out * 64, dim_out * 64

    key = jax.random.PRNGKey(0)
    kx, kw1, kb1, kw2, kb2, kx2 = jax.random.split(key, 6)

    x = jax.random.normal(kx, (B, D_in), dtype=jnp.float32)

    # Deterministic PyTorch-layout params, then convert to the kernel layout.
    w1_t = 0.1 * jax.random.normal(kw1, (D_mid, D_in), dtype=jnp.float32)
    b1_t = 0.1 * jax.random.normal(kb1, (D_mid,), dtype=jnp.float32)
    w2_t = 0.1 * jax.random.normal(kw2, (D_out, D_mid), dtype=jnp.float32)
    b2_t = 0.1 * jax.random.normal(kb2, (D_out,), dtype=jnp.float32)
    params = prepare_params(w1_t, b1_t, w2_t, b2_t)

    # 1) Fused path (weights fully resident) at the module's shipped size.
    out = jax.block_until_ready(res_fc_forward(x, params))
    ref = jax.block_until_ready(_reference_forward(x, params))
    assert out.shape == (B, D_out), out.shape
    err = float(jnp.max(jnp.abs(out.astype(jnp.float32) - ref)))
    assert err < 1e-1, err   # bf16 MXU operands, f32 accumulation

    # 2) K-tiled scaling path (P3 accumulator), forced, to exercise the branch
    #    (2 batch tiles x 2 K tiles, partial last batch block).
    x2 = jax.random.normal(kx2, (20, D_in), dtype=jnp.float32)
    out2 = jax.block_until_ready(
        res_fc_forward(x2, params, vmem_budget_bytes=0, tk=128))
    ref2 = jax.block_until_ready(_reference_forward(x2, params))
    assert out2.shape == (20, D_out), out2.shape
    err2 = float(jnp.max(jnp.abs(out2.astype(jnp.float32) - ref2)))
    assert err2 < 1e-1, err2

    print("KERNEL_OK")
</pallas_src>

<mosaic_0001>
module attributes {stable_mosaic.version = 11 : i64} {
  func.func @_res_fc_fused_kernel(%arg0: i32, %arg1: memref<8x256xbf16, #tpu.memory_space<vmem>>, %arg2: memref<256x256xbf16, #tpu.memory_space<vmem>>, %arg3: memref<1x256xf32, #tpu.memory_space<vmem>>, %arg4: memref<256x256xbf16, #tpu.memory_space<vmem>>, %arg5: memref<1x256xf32, #tpu.memory_space<vmem>>, %arg6: memref<8x256xf32, #tpu.memory_space<vmem>>) attributes {dimension_semantics = [#tpu.dimension_semantics<parallel>], iteration_bounds = array<i64: 1>, scalar_prefetch = 0 : i64, scratch_operands = 0 : i64, tpu.core_type = #tpu.core_type<tc>, window_params = [{transform_indices = @transform_0, window_bounds = array<i64: 8, 256>}, {pipeline_mode = #tpu.pipeline_mode<synchronous>, transform_indices = @transform_1, window_bounds = array<i64: 256, 256>}, {pipeline_mode = #tpu.pipeline_mode<synchronous>, transform_indices = @transform_2, window_bounds = array<i64: 1, 256>}, {pipeline_mode = #tpu.pipeline_mode<synchronous>, transform_indices = @transform_3, window_bounds = array<i64: 256, 256>}, {pipeline_mode = #tpu.pipeline_mode<synchronous>, transform_indices = @transform_4, window_bounds = array<i64: 1, 256>}, {transform_indices = @transform_5, window_bounds = array<i64: 8, 256>}]} {
    %c0 = arith.constant 0 : index
    %c0_0 = arith.constant 0 : index
    %0 = vector.load %arg1[%c0, %c0_0] : memref<8x256xbf16, #tpu.memory_space<vmem>>, vector<8x256xbf16>
    %c0_1 = arith.constant 0 : index
    %c0_2 = arith.constant 0 : index
    %1 = vector.load %arg2[%c0_1, %c0_2] : memref<256x256xbf16, #tpu.memory_space<vmem>>, vector<256x256xbf16>
    %cst = arith.constant dense<0.000000e+00> : vector<8x256xf32>
    %2 = tpu.matmul %0, %1, %cst {dimension_numbers = #tpu.dot_dimension_numbers<[1], [0], [0], [1], [0, 0, 1, 1], [], []>} : vector<8x256xbf16>, vector<256x256xbf16>, vector<8x256xf32> -> vector<8x256xf32>
    %c0_3 = arith.constant 0 : index
    %c0_4 = arith.constant 0 : index
    %3 = vector.load %arg3[%c0_3, %c0_4] : memref<1x256xf32, #tpu.memory_space<vmem>>, vector<1x256xf32>
    %4 = vector.broadcast %3 : vector<1x256xf32> to vector<8x256xf32>
    %5 = arith.addf %2, %4 : vector<8x256xf32>
    %cst_5 = arith.constant 0.000000e+00 : f32
    %6 = vector.broadcast %cst_5 : f32 to vector<8x256xf32>
    %7 = arith.maximumf %5, %6 : vector<8x256xf32>
    %8 = arith.truncf %7 : vector<8x256xf32> to vector<8x256xbf16>
    %c0_6 = arith.constant 0 : index
    %c0_7 = arith.constant 0 : index
    %9 = vector.load %arg4[%c0_6, %c0_7] : memref<256x256xbf16, #tpu.memory_space<vmem>>, vector<256x256xbf16>
    %cst_8 = arith.constant dense<0.000000e+00> : vector<8x256xf32>
    %10 = tpu.matmul %8, %9, %cst_8 {dimension_numbers = #tpu.dot_dimension_numbers<[1], [0], [0], [1], [0, 0, 1, 1], [], []>} : vector<8x256xbf16>, vector<256x256xbf16>, vector<8x256xf32> -> vector<8x256xf32>
    %c0_9 = arith.constant 0 : index
    %c0_10 = arith.constant 0 : index
    %11 = vector.load %arg5[%c0_9, %c0_10] : memref<1x256xf32, #tpu.memory_space<vmem>>, vector<1x256xf32>
    %12 = vector.broadcast %11 : vector<1x256xf32> to vector<8x256xf32>
    %13 = arith.addf %10, %12 : vector<8x256xf32>
    %c0_11 = arith.constant 0 : index
    %c0_12 = arith.constant 0 : index
    %14 = vector.load %arg6[%c0_11, %c0_12] : memref<8x256xf32, #tpu.memory_space<vmem>>, vector<8x256xf32>
    tpu.vector_store %arg6[%c0_11, %c0_12], %13 {strides = array<i32>} : memref<8x256xf32, #tpu.memory_space<vmem>>, vector<8x256xf32>,
    return
  }
  func.func @transform_0(%arg0: i32) -> (i32, i32) {
    %c0_i32 = arith.constant 0 : i32
    %c0_i32_0 = arith.constant 0 : i32
    return %arg0, %c0_i32 : i32, i32
  }
  func.func @transform_1(%arg0: i32) -> (i32, i32) {
    %c0_i32 = arith.constant 0 : i32
    %c0_i32_0 = arith.constant 0 : i32
    %c0_i32_1 = arith.constant 0 : i32
    return %c0_i32, %c0_i32_0 : i32, i32
  }
  func.func @transform_2(%arg0: i32) -> (i32, i32) {
    %c0_i32 = arith.constant 0 : i32
    %c0_i32_0 = arith.constant 0 : i32
    %c0_i32_1 = arith.constant 0 : i32
    return %c0_i32, %c0_i32_0 : i32, i32
  }
  func.func @transform_3(%arg0: i32) -> (i32, i32) {
    %c0_i32 = arith.constant 0 : i32
    %c0_i32_0 = arith.constant 0 : i32
    %c0_i32_1 = arith.constant 0 : i32
    return %c0_i32, %c0_i32_0 : i32, i32
  }
  func.func @transform_4(%arg0: i32) -> (i32, i32) {
    %c0_i32 = arith.constant 0 : i32
    %c0_i32_0 = arith.constant 0 : i32
    %c0_i32_1 = arith.constant 0 : i32
    return %c0_i32, %c0_i32_0 : i32, i32
  }
  func.func @transform_5(%arg0: i32) -> (i32, i32) {
    %c0_i32 = arith.constant 0 : i32
    %c0_i32_0 = arith.constant 0 : i32
    return %arg0, %c0_i32 : i32, i32
  }
}

module attributes {stable_mosaic.version = 11 : i64} {
  func.func @_res_fc_fused_kernel(%arg0: i32, %arg1: memref<8x256xbf16, #tpu.memory_space<vmem>>, %arg2: memref<256x256xbf16, #tpu.memory_space<vmem>>, %arg3: memref<1x256xf32, #tpu.memory_space<vmem>>, %arg4: memref<256x256xbf16, #tpu.memory_space<vmem>>, %arg5: memref<1x256xf32, #tpu.memory_space<vmem>>, %arg6: memref<8x256xf32, #tpu.memory_space<vmem>>) attributes {dimension_semantics = [#tpu.dimension_semantics<parallel>], iteration_bounds = array<i64: 1>, scalar_prefetch = 0 : i64, scratch_operands = 0 : i64, tpu.core_type = #tpu.core_type<tc>, window_params = [{transform_indices = @transform_0, window_bounds = array<i64: 8, 256>}, {pipeline_mode = #tpu.pipeline_mode<synchronous>, transform_indices = @transform_1, window_bounds = array<i64: 256, 256>}, {pipeline_mode = #tpu.pipeline_mode<synchronous>, transform_indices = @transform_2, window_bounds = array<i64: 1, 256>}, {pipeline_mode = #tpu.pipeline_mode<synchronous>, transform_indices = @transform_3, window_bounds = array<i64: 256, 256>}, {pipeline_mode = #tpu.pipeline_mode<synchronous>, transform_indices = @transform_4, window_bounds = array<i64: 1, 256>}, {transform_indices = @transform_5, window_bounds = array<i64: 8, 256>}]} {
    %c0 = arith.constant 0 : index
    %c0_0 = arith.constant 0 : index
    %0 = vector.load %arg1[%c0, %c0_0] : memref<8x256xbf16, #tpu.memory_space<vmem>>, vector<8x256xbf16>
    %c0_1 = arith.constant 0 : index
    %c0_2 = arith.constant 0 : index
    %1 = vector.load %arg2[%c0_1, %c0_2] : memref<256x256xbf16, #tpu.memory_space<vmem>>, vector<256x256xbf16>
    %cst = arith.constant dense<0.000000e+00> : vector<8x256xf32>
    %2 = tpu.matmul %0, %1, %cst {dimension_numbers = #tpu.dot_dimension_numbers<[1], [0], [0], [1], [0, 0, 1, 1], [], []>} : vector<8x256xbf16>, vector<256x256xbf16>, vector<8x256xf32> -> vector<8x256xf32>
    %c0_3 = arith.constant 0 : index
    %c0_4 = arith.constant 0 : index
    %3 = vector.load %arg3[%c0_3, %c0_4] : memref<1x256xf32, #tpu.memory_space<vmem>>, vector<1x256xf32>
    %4 = vector.broadcast %3 : vector<1x256xf32> to vector<8x256xf32>
    %5 = arith.addf %2, %4 : vector<8x256xf32>
    %cst_5 = arith.constant 0.000000e+00 : f32
    %6 = vector.broadcast %cst_5 : f32 to vector<8x256xf32>
    %7 = arith.maximumf %5, %6 : vector<8x256xf32>
    %8 = arith.truncf %7 : vector<8x256xf32> to vector<8x256xbf16>
    %c0_6 = arith.constant 0 : index
    %c0_7 = arith.constant 0 : index
    %9 = vector.load %arg4[%c0_6, %c0_7] : memref<256x256xbf16, #tpu.memory_space<vmem>>, vector<256x256xbf16>
    %cst_8 = arith.constant dense<0.000000e+00> : vector<8x256xf32>
    %10 = tpu.matmul %8, %9, %cst_8 {dimension_numbers = #tpu.dot_dimension_numbers<[1], [0], [0], [1], [0, 0, 1, 1], [], []>} : vector<8x256xbf16>, vector<256x256xbf16>, vector<8x256xf32> -> vector<8x256xf32>
    %c0_9 = arith.constant 0 : index
    %c0_10 = arith.constant 0 : index
    %11 = vector.load %arg5[%c0_9, %c0_10] : memref<1x256xf32, #tpu.memory_space<vmem>>, vector<1x256xf32>
    %12 = vector.broadcast %11 : vector<1x256xf32> to vector<8x256xf32>
    %13 = arith.addf %10, %12 : vector<8x256xf32>
    %c0_11 = arith.constant 0 : index
    %c0_12 = arith.constant 0 : index
    %14 = vector.load %arg6[%c0_11, %c0_12] : memref<8x256xf32, #tpu.memory_space<vmem>>, vector<8x256xf32>
    tpu.vector_store %arg6[%c0_11, %c0_12], %13 {strides = array<i32>} : memref<8x256xf32, #tpu.memory_space<vmem>>, vector<8x256xf32>,
    return
  }
  func.func @transform_0(%arg0: i32) -> (i32, i32) {
    %c0_i32 = arith.constant 0 : i32
    %c0_i32_0 = arith.constant 0 : i32
    return %arg0, %c0_i32 : i32, i32
  }
  func.func @transform_1(%arg0: i32) -> (i32, i32) {
    %c0_i32 = arith.constant 0 : i32
    %c0_i32_0 = arith.constant 0 : i32
    %c0_i32_1 = arith.constant 0 : i32
    return %c0_i32, %c0_i32_0 : i32, i32
  }
  func.func @transform_2(%arg0: i32) -> (i32, i32) {
    %c0_i32 = arith.constant 0 : i32
    %c0_i32_0 = arith.constant 0 : i32
    %c0_i32_1 = arith.constant 0 : i32
    return %c0_i32, %c0_i32_0 : i32, i32
  }
  func.func @transform_3(%arg0: i32) -> (i32, i32) {
    %c0_i32 = arith.constant 0 : i32
    %c0_i32_0 = arith.constant 0 : i32
    %c0_i32_1 = arith.constant 0 : i32
    return %c0_i32, %c0_i32_0 : i32, i32
  }
  func.func @transform_4(%arg0: i32) -> (i32, i32) {
    %c0_i32 = arith.constant 0 : i32
    %c0_i32_0 = arith.constant 0 : i32
    %c0_i32_1 = arith.constant 0 : i32
    return %c0_i32, %c0_i32_0 : i32, i32
  }
  func.func @transform_5(%arg0: i32) -> (i32, i32) {
    %c0_i32 = arith.constant 0 : i32
    %c0_i32_0 = arith.constant 0 : i32
    return %arg0, %c0_i32 : i32, i32
  }
}

</mosaic_0001>

<bundles_post_ra>
// kernel: tpu_custom_call.1
= control target key start
LH: loop header
LB: loop body
LE: loop exit
PB: predicated region body
PF: predicated region fallthrough
CT: control target
= control target key end

     0   :  { %10 = vsyncpa [#allocation3], 0  ;;  %s946_s0 = inlined_call_operand.hbm [shape: bf16[8,256], index: 0, kind: input, shape index: {}]   ;;  %s947_s1 = inlined_call_operand.hbm [shape: bf16[256,256], index: 1, kind: input, shape index: {}]   ;;  %s948_s2 = inlined_call_operand.vmem [shape: f32[1,256], index: 2, kind: input, shape index: {}]   ;;  %s949_s3 = inlined_call_operand.hbm [shape: bf16[256,256], index: 3, kind: input, shape index: {}]   ;;  %s950_s4 = inlined_call_operand.vmem [shape: f32[1,256], index: 4, kind: input, shape index: {}]   ;;  %s951_s5 = inlined_call_operand.hbm [shape: f32[8,256], index: 5, kind: output, shape index: {}]  }
   0x1   :  { %11 = vsyncpa [#allocation6], 0 }
   0x2   :  { %12 = vsyncpa [#allocation4], 0  ;;  %s844_s18 = smov [#allocation5]   ;;  %s750_s22 = scalar_lea.hbm %s947_s1, 4096 }
   0x3   :  { %s28_s19 = sshll.u32 %s844_s18, 4  ;;  %p751_p0 = scmp.ne.s32.totalorder %s947_s1, %s750_s22  ;;  %s29_s19 = int_to_ptr.vmem [resolvable:$true] %s28_s19 }
   0x4   :  { %p754_p1 = scmp.lt.u32.totalorder %s750_s22, %s947_s1 }
   0x6   :  { %p756_p2 = pnand %p754_p1, %p751_p0 }
   0x8   :  { %759 = shalt.err (!%p756_p2)
}
   0x9   :  { %s760_s27 = scalar_lea.vmem %s29_s19, 4096  ;;  %p765_p4 = scmp.lt.s32.totalorder %s29_s19, %s29_s19 }
   0xa   :  { %p761_p3 = scmp.ne.s32.totalorder %s29_s19, %s760_s27  ;;  %p766_p5 = scmp.lt.s32.totalorder %s760_s27, %s760_s27 }
   0xc   :  { %p767_p6 = por %p766_p5, %p765_p4 }
   0xe   :  { %p768_p7 = pnand %p767_p6, %p761_p3 }
  0x10   :  { %771 = shalt.err (!%p768_p7)
}
  0x11   :  { %s845_s28 = smov 128   ;;  %s846_s29 = smov 8  }
  0x12   :  { %34 = dma.hbm_to_vmem [thread:$0]  %s947_s1, 4096, %s29_s19, [#allocation6], %s845_s28, %s845_s28, %s846_s29  }
  0x13   :  { %s847_s7 = smov [#allocation2]   ;;  %s848_s9 = smov [#allocation7]  }
  0x14   :  { %s19_s8 = sshll.u32 %s847_s7, 4  ;;  %s42_s10 = sshll.u32 %s848_s9, 4  ;;  %s20_s8 = int_to_ptr.vmem [resolvable:$true] %s19_s8  ;;  %s43_s10 = int_to_ptr.vmem [resolvable:$true] %s42_s10 }
  0x15   :  { %s772_s13 = scalar_lea.hbm %s946_s0, 128 }
  0x16   :  { %p773_p8 = scmp.ne.s32.totalorder %s946_s0, %s772_s13  ;;  %p776_p9 = scmp.lt.u32.totalorder %s772_s13, %s946_s0 }
  0x18   :  { %p778_p10 = pnand %p776_p9, %p773_p8 }
  0x1a   :  { %781 = shalt.err (!%p778_p10)
}
  0x1b   :  { %s782_s1 = scalar_lea.vmem %s20_s8, 128  ;;  %p787_p12 = scmp.lt.s32.totalorder %s20_s8, %s20_s8 }
  0x1c   :  { %p783_p11 = scmp.ne.s32.totalorder %s20_s8, %s782_s1  ;;  %p788_p13 = scmp.lt.s32.totalorder %s782_s1, %s782_s1 }
  0x1e   :  { %p789_p0 = por %p788_p13, %p787_p12 }
  0x20   :  { %p790_p1 = pnand %p789_p0, %p783_p11 }
  0x22   :  { %793 = shalt.err (!%p790_p1)
}
  0x23   :  { %22 = dma.hbm_to_vmem [thread:$0]  %s946_s0, 128, %s20_s8, [#allocation3]  }
  0x24   :  { %s794_s22 = scalar_lea.hbm %s949_s3, 4096 }
  0x25   :  { %p795_p2 = scmp.ne.s32.totalorder %s949_s3, %s794_s22  ;;  %p798_p3 = scmp.lt.u32.totalorder %s794_s22, %s949_s3 }
  0x27   :  { %p800_p4 = pnand %p798_p3, %p795_p2 }
  0x29   :  { %803 = shalt.err (!%p800_p4)
}
  0x2a   :  { %s804_s27 = scalar_lea.vmem %s43_s10, 4096  ;;  %p809_p6 = scmp.lt.s32.totalorder %s43_s10, %s43_s10 }
  0x2b   :  { %p805_p5 = scmp.ne.s32.totalorder %s43_s10, %s804_s27  ;;  %p810_p7 = scmp.lt.s32.totalorder %s804_s27, %s804_s27 }
  0x2d   :  { %p811_p8 = por %p810_p7, %p809_p6 }
  0x2f   :  { %p812_p9 = pnand %p811_p8, %p805_p5 }
  0x31   :  { %815 = shalt.err (!%p812_p9)
}
  0x32   :  { %48 = dma.hbm_to_vmem [thread:$0]  %s949_s3, 4096, %s43_s10, [#allocation6], %s845_s28, %s845_s28, %s846_s29  }
  0x33   :  { %838 = dma.done.wait [#allocation3], 128  }
  0x34   :  { %839 = vsyncadd [#allocation3], 4294967168 }
  0x35   :  { %840 = dma.done.wait [#allocation6], 8192  }
  0x36   :  { %841 = vsyncadd [#allocation6], 4294959104  ;;  %v652_v0 = vld [vmem:[#allocation5 + $0x4] ss:$8 sps:$4 sm:$0xff]   ;;  %v654_v1 = vld [vmem:[#allocation5] ss:$8 sps:$4 sm:$0xff]  }
  0x37   :  { %272 = vmatprep.subr.bf16.mxu0 %v652_v0  ;;  %v655_v2 = vld [vmem:[#allocation5 + $0x14] ss:$8 sps:$4 sm:$0xff]   ;;  %v657_v3 = vld [vmem:[#allocation5 + $0x10] ss:$8 sps:$4 sm:$0xff]   ;;  %v658_v4 = vld [vmem:[#allocation5 + $0x24] ss:$8 sps:$4 sm:$0xff]  }
  0x38   :  { %273 = vmatpush1.bf16.msra.mxu0 %v654_v1  ;;  %v660_v5 = vld [vmem:[#allocation5 + $0x20] ss:$8 sps:$4 sm:$0xff]   ;;  %v661_v6 = vld [vmem:[#allocation5 + $0x34] ss:$8 sps:$4 sm:$0xff]   ;;  %v663_v7 = vld [vmem:[#allocation5 + $0x30] ss:$8 sps:$4 sm:$0xff]  }
  0x39   :  { %274 = vmatprep.subr.bf16.mxu0 %v655_v2  ;;  %v664_v8 = vld [vmem:[#allocation5 + $0x44] ss:$8 sps:$4 sm:$0xff]   ;;  %v666_v9 = vld [vmem:[#allocation5 + $0x40] ss:$8 sps:$4 sm:$0xff]   ;;  %v667_v10 = vld [vmem:[#allocation5 + $0x54] ss:$8 sps:$4 sm:$0xff]  }
  0x3a   :  { %v669_v11 = vld [vmem:[#allocation5 + $0x50] ss:$8 sps:$4 sm:$0xff]   ;;  %v670_v12 = vld [vmem:[#allocation5 + $0x64] ss:$8 sps:$4 sm:$0xff]   ;;  %v672_v13 = vld [vmem:[#allocation5 + $0x60] ss:$8 sps:$4 sm:$0xff]  }
  0x3b   :  { %v922_v14 = vld [vmem:[#allocation2] sm:$0xff]  ;;  %v702_v16 = vld [vmem:[#allocation7 + $0x4] ss:$8 sps:$4 sm:$0xff]   ;;  %v704_v17 = vld [vmem:[#allocation7] ss:$8 sps:$4 sm:$0xff]  }
  0x3c   :  { %275 = vmatpush1.bf16.msra.mxu0 %v657_v3  ;;  %v581_v15 = vcombine.high %v922_v14, %v922_v14  ;;  %v705_v18 = vld [vmem:[#allocation7 + $0x14] ss:$8 sps:$4 sm:$0xff]   ;;  %521 = vmatprep.subr.bf16.mxu1 %v702_v16  ;;  %v675_v20 = vld [vmem:[#allocation5 + $0x70] ss:$8 sps:$4 sm:$0xff]   ;;  %v708_v22 = vld [vmem:[#allocation7 + $0x24] ss:$8 sps:$4 sm:$0xff]   ;;  %v580_v55 = vcombine.low %v922_v14, %v922_v14  ;;  %v95_v3 = vlaneseq }
  0x3d   :  { %276 = vmatprep.subr.bf16.mxu0 %v658_v4  ;;  %v673_v19 = vld [vmem:[#allocation5 + $0x74] ss:$8 sps:$4 sm:$0xff]   ;;  %522 = vmatpush1.bf16.msra.mxu1 %v704_v17  ;;  %v707_v21 = vld [vmem:[#allocation7 + $0x10] ss:$8 sps:$4 sm:$0xff]   ;;  %v676_v23 = vld [vmem:[#allocation5 + $0x84] ss:$8 sps:$4 sm:$0xff]  }
  0x3e   :  { %304 = vmatprep.mubr.bf16.mxu0 %v581_v15  ;;  %523 = vmatprep.subr.bf16.mxu1 %v705_v18  ;;  %v678_v24 = vld [vmem:[#allocation5 + $0x80] ss:$8 sps:$4 sm:$0xff]   ;;  %v711_v26 = vld [vmem:[#allocation7 + $0x34] ss:$8 sps:$4 sm:$0xff]   ;;  %v681_v28 = vld [vmem:[#allocation5 + $0x90] ss:$8 sps:$4 sm:$0xff]  }
  0x3f   :  { %v710_v25 = vld [vmem:[#allocation7 + $0x20] ss:$8 sps:$4 sm:$0xff]   ;;  %v679_v27 = vld [vmem:[#allocation5 + $0x94] ss:$8 sps:$4 sm:$0xff]   ;;  %v713_v29 = vld [vmem:[#allocation7 + $0x30] ss:$8 sps:$4 sm:$0xff]  }
  0x40   :  { %277 = vmatpush1.bf16.msra.mxu0 %v660_v5  ;;  %v714_v30 = vld [vmem:[#allocation7 + $0x44] ss:$8 sps:$4 sm:$0xff]   ;;  %v684_v32 = vld [vmem:[#allocation5 + $0xa0] ss:$8 sps:$4 sm:$0xff]   ;;  %v717_v34 = vld [vmem:[#allocation7 + $0x54] ss:$8 sps:$4 sm:$0xff]  }
  0x41   :  { %278 = vmatprep.subr.bf16.mxu0 %v661_v6  ;;  %524 = vmatpush1.bf16.msra.mxu1 %v707_v21  ;;  %v682_v31 = vld [vmem:[#allocation5 + $0xa4] ss:$8 sps:$4 sm:$0xff]   ;;  %v716_v33 = vld [vmem:[#allocation7 + $0x40] ss:$8 sps:$4 sm:$0xff]   ;;  %v685_v35 = vld [vmem:[#allocation5 + $0xb4] ss:$8 sps:$4 sm:$0xff]  }
  0x42   :  { %525 = vmatprep.subr.bf16.mxu1 %v708_v22  ;;  %v719_v36 = vld [vmem:[#allocation7 + $0x50] ss:$8 sps:$4 sm:$0xff]   ;;  %v720_v38 = vld [vmem:[#allocation7 + $0x64] ss:$8 sps:$4 sm:$0xff]   ;;  %v722_v40 = vld [vmem:[#allocation7 + $0x60] ss:$8 sps:$4 sm:$0xff]  }
  0x43   :  { %v687_v37 = vld [vmem:[#allocation5 + $0xb0] ss:$8 sps:$4 sm:$0xff]   ;;  %v688_v39 = vld [vmem:[#allocation5 + $0xc4] ss:$8 sps:$4 sm:$0xff]   ;;  %v690_v41 = vld [vmem:[#allocation5 + $0xc0] ss:$8 sps:$4 sm:$0xff]  }
  0x44   :  { %279 = vmatpush1.bf16.msra.mxu0 %v663_v7  ;;  %v723_v42 = vld [vmem:[#allocation7 + $0x74] ss:$8 sps:$4 sm:$0xff]   ;;  %v725_v44 = vld [vmem:[#allocation7 + $0x70] ss:$8 sps:$4 sm:$0xff]   ;;  %v726_v46 = vld [vmem:[#allocation7 + $0x84] ss:$8 sps:$4 sm:$0xff]  }
  0x45   :  { %280 = vmatprep.subr.bf16.mxu0 %v664_v8  ;;  %526 = vmatpush1.bf16.msra.mxu1 %v710_v25  ;;  %v691_v43 = vld [vmem:[#allocation5 + $0xd4] ss:$8 sps:$4 sm:$0xff]   ;;  %v693_v45 = vld [vmem:[#allocation5 + $0xd0] ss:$8 sps:$4 sm:$0xff]   ;;  %v694_v47 = vld [vmem:[#allocation5 + $0xe4] ss:$8 sps:$4 sm:$0xff]  }
  0x46   :  { %527 = vmatprep.subr.bf16.mxu1 %v711_v26  ;;  %v728_v48 = vld [vmem:[#allocation7 + $0x80] ss:$8 sps:$4 sm:$0xff]   ;;  %v729_v50 = vld [vmem:[#allocation7 + $0x94] ss:$8 sps:$4 sm:$0xff]   ;;  %v731_v52 = vld [vmem:[#allocation7 + $0x90] ss:$8 sps:$4 sm:$0xff]  }
  0x47   :  { %v696_v49 = vld [vmem:[#allocation5 + $0xe0] ss:$8 sps:$4 sm:$0xff]   ;;  %v697_v51 = vld [vmem:[#allocation5 + $0xf4] ss:$8 sps:$4 sm:$0xff]   ;;  %v699_v53 = vld [vmem:[#allocation5 + $0xf0] ss:$8 sps:$4 sm:$0xff]  }
  0x48   :  { %281 = vmatpush1.bf16.msra.mxu0 %v666_v9  ;;  %v732_v54 = vld [vmem:[#allocation7 + $0xa4] ss:$8 sps:$4 sm:$0xff]   ;;  %v734_v56 = vld [vmem:[#allocation7 + $0xa0] ss:$8 sps:$4 sm:$0xff]   ;;  %v735_v57 = vld [vmem:[#allocation7 + $0xb4] ss:$8 sps:$4 sm:$0xff]  }
  0x49   :  { %282 = vmatprep.subr.bf16.mxu0 %v667_v10  ;;  %528 = vmatpush1.bf16.msra.mxu1 %v713_v29  ;;  %v737_v58 = vld [vmem:[#allocation7 + $0xb0] ss:$8 sps:$4 sm:$0xff]   ;;  %v738_v59 = vld [vmem:[#allocation7 + $0xc4] ss:$8 sps:$4 sm:$0xff]   ;;  %v740_v60 = vld [vmem:[#allocation7 + $0xc0] ss:$8 sps:$4 sm:$0xff]  }
  0x4a   :  { %529 = vmatprep.subr.bf16.mxu1 %v714_v30  ;;  %v741_v61 = vld [vmem:[#allocation7 + $0xd4] ss:$8 sps:$4 sm:$0xff]   ;;  %v743_v62 = vld [vmem:[#allocation7 + $0xd0] ss:$8 sps:$4 sm:$0xff]   ;;  %v744_v63 = vld [vmem:[#allocation7 + $0xe4] ss:$8 sps:$4 sm:$0xff]  }
  0x4b   :  { %v746_v0 = vld [vmem:[#allocation7 + $0xe0] ss:$8 sps:$4 sm:$0xff]   ;;  %v747_v1 = vld [vmem:[#allocation7 + $0xf4] ss:$8 sps:$4 sm:$0xff]   ;;  %v749_v2 = vld [vmem:[#allocation7 + $0xf0] ss:$8 sps:$4 sm:$0xff]  }
  0x4c   :  { %283 = vmatpush1.bf16.msra.mxu0 %v669_v11  ;;  %v96_v4 = vshrl.u32 %v95_v3, 7  ;;  %v93_v6 = vld [vmem:[%s948_s2] sm:$0x3]  ;;  %s849_s2 = smov [#allocation8]  }
  0x4d   :  { %284 = vmatprep.subr.bf16.mxu0 %v670_v12  ;;  %530 = vmatpush1.bf16.msra.mxu1 %v716_v33  ;;  %s570_s7 = sshll.u32 %s849_s2, 4  ;;  %s571_s7 = int_to_ptr.vmem [resolvable:$true] %s570_s7 }
  0x4e   :  { %531 = vmatprep.subr.bf16.mxu1 %v717_v34  ;;  %v97_v5 = vsub.s32 0, %v96_v4  ;;  %v101_v7 = vsub.s32 1, %v96_v4  ;;  %s816_s8 = scalar_lea.vmem %s571_s7, 256  ;;  %p821_p11 = scmp.lt.s32.totalorder %s571_s7, %s571_s7 }
  0x4f   :  { %p817_p10 = scmp.ne.s32.totalorder %s571_s7, %s816_s8  ;;  %p822_p12 = scmp.lt.s32.totalorder %s816_s8, %s816_s8 }
  0x50   :  { %285 = vmatpush1.bf16.msra.mxu0 %v672_v13  ;;  %v98_v8 = vrot.slane %v93_v6, %v97_v5  ;;  %v102_v9 = vrot.slane %v93_v6, %v101_v7 }
  0x51   :  { %286 = vmatprep.subr.bf16.mxu0 %v673_v19  ;;  %532 = vmatpush1.bf16.msra.mxu1 %v719_v36  ;;  %p823_p13 = por %p822_p12, %p821_p11 }
  0x52   :  { %533 = vmatprep.subr.bf16.mxu1 %v720_v38 }
  0x53   :  { %p824_p0 = pnand %p823_p13, %p817_p10 }
  0x54   :  { %287 = vmatpush1.bf16.msra.mxu0 %v675_v20  ;;  %v349_v20 = vld [vmem:[%s950_s4] sm:$0x3] }
  0x55   :  { %288 = vmatprep.subr.bf16.mxu0 %v676_v23  ;;  %534 = vmatpush1.bf16.msra.mxu1 %v722_v40  ;;  %v354_v21 = vrot.slane %v349_v20, %v97_v5  ;;  %v358_v22 = vrot.slane %v349_v20, %v101_v7 }
  0x56   :  { %535 = vmatprep.subr.bf16.mxu1 %v723_v42 }
  0x58   :  { %289 = vmatpush1.bf16.msra.mxu0 %v678_v24 }
  0x59   :  { %290 = vmatprep.subr.bf16.mxu0 %v679_v27  ;;  %536 = vmatpush1.bf16.msra.mxu1 %v725_v44 }
  0x5a   :  { %537 = vmatprep.subr.bf16.mxu1 %v726_v46 }
  0x5c   :  { %291 = vmatpush1.bf16.msra.mxu0 %v681_v28 }
  0x5d   :  { %292 = vmatprep.subr.bf16.mxu0 %v682_v31  ;;  %538 = vmatpush1.bf16.msra.mxu1 %v728_v48 }
  0x5e   :  { %539 = vmatprep.subr.bf16.mxu1 %v729_v50 }
  0x60   :  { %293 = vmatpush1.bf16.msra.mxu0 %v684_v32 }
  0x61   :  { %294 = vmatprep.subr.bf16.mxu0 %v685_v35  ;;  %540 = vmatpush1.bf16.msra.mxu1 %v731_v52 }
  0x62   :  { %541 = vmatprep.subr.bf16.mxu1 %v732_v54 }
  0x64   :  { %295 = vmatpush1.bf16.msra.mxu0 %v687_v37 }
  0x65   :  { %296 = vmatprep.subr.bf16.mxu0 %v688_v39  ;;  %542 = vmatpush1.bf16.msra.mxu1 %v734_v56 }
  0x66   :  { %543 = vmatprep.subr.bf16.mxu1 %v735_v57 }
  0x68   :  { %297 = vmatpush1.bf16.msra.mxu0 %v690_v41 }
  0x69   :  { %298 = vmatprep.subr.bf16.mxu0 %v691_v43  ;;  %544 = vmatpush1.bf16.msra.mxu1 %v737_v58 }
  0x6a   :  { %545 = vmatprep.subr.bf16.mxu1 %v738_v59 }
  0x6c   :  { %299 = vmatpush1.bf16.msra.mxu0 %v693_v45 }
  0x6d   :  { %300 = vmatprep.subr.bf16.mxu0 %v694_v47  ;;  %546 = vmatpush1.bf16.msra.mxu1 %v740_v60 }
  0x6e   :  { %547 = vmatprep.subr.bf16.mxu1 %v741_v61 }
  0x70   :  { %301 = vmatpush1.bf16.msra.mxu0 %v696_v49 }
  0x71   :  { %302 = vmatprep.subr.bf16.mxu0 %v697_v51  ;;  %548 = vmatpush1.bf16.msra.mxu1 %v743_v62 }
  0x72   :  { %549 = vmatprep.subr.bf16.mxu1 %v744_v63 }
  0x74   :  { %303 = vmatpush1.bf16.msra.mxu0 %v699_v53 }
  0x75   :  { %550 = vmatpush1.bf16.msra.mxu1 %v746_v0 }
  0x76   :  { %551 = vmatprep.subr.bf16.mxu1 %v747_v1 }
  0x77   :  { %305 = vmatmul.mubr.bf16.vlgmr.msra.gmra.mrb[0].mxu0 %v580_v55 }
  0x79   :  { %552 = vmatpush1.bf16.msra.mxu1 %v749_v2 }
 0x14a   :  { %v306_v10 = vpop.f32.mrb[0].mxu0 }
 0x14b   :  { %v307_v11 = vadd.f32 %v306_v10, %v98_v8  ;;  %v308_v12 = vpop.f32.mrb[1].mxu0 }
 0x14c   :  { %v309_v13 = vadd.f32 %v308_v12, %v102_v9  ;;  %v310_v14 = vpop.f32.mrb[2].mxu0 }
 0x14d   :  { %v313_v15 = vmax.f32 %v307_v11, 0.0  ;;  %v311_v16 = vpop.f32.mrb[3].mxu0 }
 0x14e   :  { %v314_v17 = vmax.f32 %v309_v13, 0.0 }
 0x14f   :  { %v315_v19 = vpack.c.bf16 %v313_v15, %v313_v15 }
 0x150   :  { %v316_v18 = vpack.c.bf16 %v314_v17, %v314_v17 }
 0x152   :  { %553 = vmatprep.mubr.bf16.mxu1 %v316_v18 }
 0x153   :  { %554 = vmatmul.mubr.bf16.vlgmr.msra.gmra.mrb[0].mxu1 %v315_v19 }
 0x226   :  { %v555_v23 = vpop.f32.mrb[0].mxu1 }
 0x227   :  { %v556_v24 = vadd.f32 %v555_v23, %v354_v21  ;;  %v557_v25 = vpop.f32.mrb[1].mxu1 }
 0x228   :  { %v558_v26 = vadd.f32 %v557_v25, %v358_v22  ;;  %v559_v27 = vpop.f32.mrb[2].mxu1 }
 0x229   :  { %562 = vst [vmem:[#allocation8] sm:$0xff] %v556_v24  ;;  %v560_v28 = vpop.f32.mrb[3].mxu1 }
 0x22a   :  { %563 = vst [vmem:[#allocation8 + $0x8] sm:$0xff] %v558_v26 }
 0x22b   :  { %827 = shalt.err (!%p824_p0)
}
 0x22c   :  { %s828_s10 = scalar_lea.hbm %s951_s5, 256 }
 0x22d   :  { %p829_p1 = scmp.ne.s32.totalorder %s951_s5, %s828_s10  ;;  %p832_p2 = scmp.lt.u32.totalorder %s828_s10, %s951_s5 }
 0x22f   :  { %p834_p3 = pnand %p832_p2, %p829_p1 }
 0x231   :  { %837 = shalt.err (!%p834_p3)
}
 0x232   :  { %573 = dma.vmem_to_hbm [thread:$0]  %s571_s7, 256, %s951_s5, [#allocation4]  }
 0x233   :  { %842 = dma.done.wait [#allocation4], 256  }
 0x234   :  { %843 = vsyncadd [#allocation4], 4294967040 }
 0x235   :  { %577 = vsyncpa [#allocation3], 1 }
 0x236   :  { %578 = vsyncpa [#allocation6], 1 }
 0x237   :  { %579 = vsyncpa [#allocation4], 1 }

// kernel: tpu_custom_call.1
= control target key start
LH: loop header
LB: loop body
LE: loop exit
PB: predicated region body
PF: predicated region fallthrough
CT: control target
= control target key end

     0   :  { %10 = vsyncpa [#allocation3], 0  ;;  %s946_s0 = inlined_call_operand.hbm [shape: bf16[8,256], index: 0, kind: input, shape index: {}]   ;;  %s947_s1 = inlined_call_operand.hbm [shape: bf16[256,256], index: 1, kind: input, shape index: {}]   ;;  %s948_s2 = inlined_call_operand.vmem [shape: f32[1,256], index: 2, kind: input, shape index: {}]   ;;  %s949_s3 = inlined_call_operand.hbm [shape: bf16[256,256], index: 3, kind: input, shape index: {}]   ;;  %s950_s4 = inlined_call_operand.vmem [shape: f32[1,256], index: 4, kind: input, shape index: {}]   ;;  %s951_s5 = inlined_call_operand.hbm [shape: f32[8,256], index: 5, kind: output, shape index: {}]  }
   0x1   :  { %11 = vsyncpa [#allocation6], 0 }
   0x2   :  { %12 = vsyncpa [#allocation4], 0  ;;  %s844_s18 = smov [#allocation5]   ;;  %s750_s22 = scalar_lea.hbm %s947_s1, 4096 }
   0x3   :  { %s28_s19 = sshll.u32 %s844_s18, 4  ;;  %p751_p0 = scmp.ne.s32.totalorder %s947_s1, %s750_s22  ;;  %s29_s19 = int_to_ptr.vmem [resolvable:$true] %s28_s19 }
   0x4   :  { %p754_p1 = scmp.lt.u32.totalorder %s750_s22, %s947_s1 }
   0x6   :  { %p756_p2 = pnand %p754_p1, %p751_p0 }
   0x8   :  { %759 = shalt.err (!%p756_p2)
}
   0x9   :  { %s760_s27 = scalar_lea.vmem %s29_s19, 4096  ;;  %p765_p4 = scmp.lt.s32.totalorder %s29_s19, %s29_s19 }
   0xa   :  { %p761_p3 = scmp.ne.s32.totalorder %s29_s19, %s760_s27  ;;  %p766_p5 = scmp.lt.s32.totalorder %s760_s27, %s760_s27 }
   0xc   :  { %p767_p6 = por %p766_p5, %p765_p4 }
   0xe   :  { %p768_p7 = pnand %p767_p6, %p761_p3 }
  0x10   :  { %771 = shalt.err (!%p768_p7)
}
  0x11   :  { %s845_s28 = smov 128   ;;  %s846_s29 = smov 8  }
  0x12   :  { %34 = dma.hbm_to_vmem [thread:$0]  %s947_s1, 4096, %s29_s19, [#allocation6], %s845_s28, %s845_s28, %s846_s29  }
  0x13   :  { %s847_s7 = smov [#allocation2]   ;;  %s848_s9 = smov [#allocation7]  }
  0x14   :  { %s19_s8 = sshll.u32 %s847_s7, 4  ;;  %s42_s10 = sshll.u32 %s848_s9, 4  ;;  %s20_s8 = int_to_ptr.vmem [resolvable:$true] %s19_s8  ;;  %s43_s10 = int_to_ptr.vmem [resolvable:$true] %s42_s10 }
  0x15   :  { %s772_s13 = scalar_lea.hbm %s946_s0, 128 }
  0x16   :  { %p773_p8 = scmp.ne.s32.totalorder %s946_s0, %s772_s13  ;;  %p776_p9 = scmp.lt.u32.totalorder %s772_s13, %s946_s0 }
  0x18   :  { %p778_p10 = pnand %p776_p9, %p773_p8 }
  0x1a   :  { %781 = shalt.err (!%p778_p10)
}
  0x1b   :  { %s782_s1 = scalar_lea.vmem %s20_s8, 128  ;;  %p787_p12 = scmp.lt.s32.totalorder %s20_s8, %s20_s8 }
  0x1c   :  { %p783_p11 = scmp.ne.s32.totalorder %s20_s8, %s782_s1  ;;  %p788_p13 = scmp.lt.s32.totalorder %s782_s1, %s782_s1 }
  0x1e   :  { %p789_p0 = por %p788_p13, %p787_p12 }
  0x20   :  { %p790_p1 = pnand %p789_p0, %p783_p11 }
  0x22   :  { %793 = shalt.err (!%p790_p1)
}
  0x23   :  { %22 = dma.hbm_to_vmem [thread:$0]  %s946_s0, 128, %s20_s8, [#allocation3]  }
  0x24   :  { %s794_s22 = scalar_lea.hbm %s949_s3, 4096 }
  0x25   :  { %p795_p2 = scmp.ne.s32.totalorder %s949_s3, %s794_s22  ;;  %p798_p3 = scmp.lt.u32.totalorder %s794_s22, %s949_s3 }
  0x27   :  { %p800_p4 = pnand %p798_p3, %p795_p2 }
  0x29   :  { %803 = shalt.err (!%p800_p4)
}
  0x2a   :  { %s804_s27 = scalar_lea.vmem %s43_s10, 4096  ;;  %p809_p6 = scmp.lt.s32.totalorder %s43_s10, %s43_s10 }
  0x2b   :  { %p805_p5 = scmp.ne.s32.totalorder %s43_s10, %s804_s27  ;;  %p810_p7 = scmp.lt.s32.totalorder %s804_s27, %s804_s27 }
  0x2d   :  { %p811_p8 = por %p810_p7, %p809_p6 }
  0x2f   :  { %p812_p9 = pnand %p811_p8, %p805_p5 }
  0x31   :  { %815 = shalt.err (!%p812_p9)
}
  0x32   :  { %48 = dma.hbm_to_vmem [thread:$0]  %s949_s3, 4096, %s43_s10, [#allocation6], %s845_s28, %s845_s28, %s846_s29  }
  0x33   :  { %838 = dma.done.wait [#allocation3], 128  }
  0x34   :  { %839 = vsyncadd [#allocation3], 4294967168 }
  0x35   :  { %840 = dma.done.wait [#allocation6], 8192  }
  0x36   :  { %841 = vsyncadd [#allocation6], 4294959104  ;;  %v652_v0 = vld [vmem:[#allocation5 + $0x4] ss:$8 sps:$4 sm:$0xff]   ;;  %v654_v1 = vld [vmem:[#allocation5] ss:$8 sps:$4 sm:$0xff]  }
  0x37   :  { %272 = vmatprep.subr.bf16.mxu0 %v652_v0  ;;  %v655_v2 = vld [vmem:[#allocation5 + $0x14] ss:$8 sps:$4 sm:$0xff]   ;;  %v657_v3 = vld [vmem:[#allocation5 + $0x10] ss:$8 sps:$4 sm:$0xff]   ;;  %v658_v4 = vld [vmem:[#allocation5 + $0x24] ss:$8 sps:$4 sm:$0xff]  }
  0x38   :  { %273 = vmatpush1.bf16.msra.mxu0 %v654_v1  ;;  %v660_v5 = vld [vmem:[#allocation5 + $0x20] ss:$8 sps:$4 sm:$0xff]   ;;  %v661_v6 = vld [vmem:[#allocation5 + $0x34] ss:$8 sps:$4 sm:$0xff]   ;;  %v663_v7 = vld [vmem:[#allocation5 + $0x30] ss:$8 sps:$4 sm:$0xff]  }
  0x39   :  { %274 = vmatprep.subr.bf16.mxu0 %v655_v2  ;;  %v664_v8 = vld [vmem:[#allocation5 + $0x44] ss:$8 sps:$4 sm:$0xff]   ;;  %v666_v9 = vld [vmem:[#allocation5 + $0x40] ss:$8 sps:$4 sm:$0xff]   ;;  %v667_v10 = vld [vmem:[#allocation5 + $0x54] ss:$8 sps:$4 sm:$0xff]  }
  0x3a   :  { %v669_v11 = vld [vmem:[#allocation5 + $0x50] ss:$8 sps:$4 sm:$0xff]   ;;  %v670_v12 = vld [vmem:[#allocation5 + $0x64] ss:$8 sps:$4 sm:$0xff]   ;;  %v672_v13 = vld [vmem:[#allocation5 + $0x60] ss:$8 sps:$4 sm:$0xff]  }
  0x3b   :  { %v922_v14 = vld [vmem:[#allocation2] sm:$0xff]  ;;  %v702_v16 = vld [vmem:[#allocation7 + $0x4] ss:$8 sps:$4 sm:$0xff]   ;;  %v704_v17 = vld [vmem:[#allocation7] ss:$8 sps:$4 sm:$0xff]  }
  0x3c   :  { %275 = vmatpush1.bf16.msra.mxu0 %v657_v3  ;;  %v581_v15 = vcombine.high %v922_v14, %v922_v14  ;;  %v705_v18 = vld [vmem:[#allocation7 + $0x14] ss:$8 sps:$4 sm:$0xff]   ;;  %521 = vmatprep.subr.bf16.mxu1 %v702_v16  ;;  %v675_v20 = vld [vmem:[#allocation5 + $0x70] ss:$8 sps:$4 sm:$0xff]   ;;  %v708_v22 = vld [vmem:[#allocation7 + $0x24] ss:$8 sps:$4 sm:$0xff]   ;;  %v580_v55 = vcombine.low %v922_v14, %v922_v14  ;;  %v95_v3 = vlaneseq }
  0x3d   :  { %276 = vmatprep.subr.bf16.mxu0 %v658_v4  ;;  %v673_v19 = vld [vmem:[#allocation5 + $0x74] ss:$8 sps:$4 sm:$0xff]   ;;  %522 = vmatpush1.bf16.msra.mxu1 %v704_v17  ;;  %v707_v21 = vld [vmem:[#allocation7 + $0x10] ss:$8 sps:$4 sm:$0xff]   ;;  %v676_v23 = vld [vmem:[#allocation5 + $0x84] ss:$8 sps:$4 sm:$0xff]  }
  0x3e   :  { %304 = vmatprep.mubr.bf16.mxu0 %v581_v15  ;;  %523 = vmatprep.subr.bf16.mxu1 %v705_v18  ;;  %v678_v24 = vld [vmem:[#allocation5 + $0x80] ss:$8 sps:$4 sm:$0xff]   ;;  %v711_v26 = vld [vmem:[#allocation7 + $0x34] ss:$8 sps:$4 sm:$0xff]   ;;  %v681_v28 = vld [vmem:[#allocation5 + $0x90] ss:$8 sps:$4 sm:$0xff]  }
  0x3f   :  { %v710_v25 = vld [vmem:[#allocation7 + $0x20] ss:$8 sps:$4 sm:$0xff]   ;;  %v679_v27 = vld [vmem:[#allocation5 + $0x94] ss:$8 sps:$4 sm:$0xff]   ;;  %v713_v29 = vld [vmem:[#allocation7 + $0x30] ss:$8 sps:$4 sm:$0xff]  }
  0x40   :  { %277 = vmatpush1.bf16.msra.mxu0 %v660_v5  ;;  %v714_v30 = vld [vmem:[#allocation7 + $0x44] ss:$8 sps:$4 sm:$0xff]   ;;  %v684_v32 = vld [vmem:[#allocation5 + $0xa0] ss:$8 sps:$4 sm:$0xff]   ;;  %v717_v34 = vld [vmem:[#allocation7 + $0x54] ss:$8 sps:$4 sm:$0xff]  }
  0x41   :  { %278 = vmatprep.subr.bf16.mxu0 %v661_v6  ;;  %524 = vmatpush1.bf16.msra.mxu1 %v707_v21  ;;  %v682_v31 = vld [vmem:[#allocation5 + $0xa4] ss:$8 sps:$4 sm:$0xff]   ;;  %v716_v33 = vld [vmem:[#allocation7 + $0x40] ss:$8 sps:$4 sm:$0xff]   ;;  %v685_v35 = vld [vmem:[#allocation5 + $0xb4] ss:$8 sps:$4 sm:$0xff]  }
  0x42   :  { %525 = vmatprep.subr.bf16.mxu1 %v708_v22  ;;  %v719_v36 = vld [vmem:[#allocation7 + $0x50] ss:$8 sps:$4 sm:$0xff]   ;;  %v720_v38 = vld [vmem:[#allocation7 + $0x64] ss:$8 sps:$4 sm:$0xff]   ;;  %v722_v40 = vld [vmem:[#allocation7 + $0x60] ss:$8 sps:$4 sm:$0xff]  }
  0x43   :  { %v687_v37 = vld [vmem:[#allocation5 + $0xb0] ss:$8 sps:$4 sm:$0xff]   ;;  %v688_v39 = vld [vmem:[#allocation5 + $0xc4] ss:$8 sps:$4 sm:$0xff]   ;;  %v690_v41 = vld [vmem:[#allocation5 + $0xc0] ss:$8 sps:$4 sm:$0xff]  }
  0x44   :  { %279 = vmatpush1.bf16.msra.mxu0 %v663_v7  ;;  %v723_v42 = vld [vmem:[#allocation7 + $0x74] ss:$8 sps:$4 sm:$0xff]   ;;  %v725_v44 = vld [vmem:[#allocation7 + $0x70] ss:$8 sps:$4 sm:$0xff]   ;;  %v726_v46 = vld [vmem:[#allocation7 + $0x84] ss:$8 sps:$4 sm:$0xff]  }
  0x45   :  { %280 = vmatprep.subr.bf16.mxu0 %v664_v8  ;;  %526 = vmatpush1.bf16.msra.mxu1 %v710_v25  ;;  %v691_v43 = vld [vmem:[#allocation5 + $0xd4] ss:$8 sps:$4 sm:$0xff]   ;;  %v693_v45 = vld [vmem:[#allocation5 + $0xd0] ss:$8 sps:$4 sm:$0xff]   ;;  %v694_v47 = vld [vmem:[#allocation5 + $0xe4] ss:$8 sps:$4 sm:$0xff]  }
  0x46   :  { %527 = vmatprep.subr.bf16.mxu1 %v711_v26  ;;  %v728_v48 = vld [vmem:[#allocation7 + $0x80] ss:$8 sps:$4 sm:$0xff]   ;;  %v729_v50 = vld [vmem:[#allocation7 + $0x94] ss:$8 sps:$4 sm:$0xff]   ;;  %v731_v52 = vld [vmem:[#allocation7 + $0x90] ss:$8 sps:$4 sm:$0xff]  }
  0x47   :  { %v696_v49 = vld [vmem:[#allocation5 + $0xe0] ss:$8 sps:$4 sm:$0xff]   ;;  %v697_v51 = vld [vmem:[#allocation5 + $0xf4] ss:$8 sps:$4 sm:$0xff]   ;;  %v699_v53 = vld [vmem:[#allocation5 + $0xf0] ss:$8 sps:$4 sm:$0xff]  }
  0x48   :  { %281 = vmatpush1.bf16.msra.mxu0 %v666_v9  ;;  %v732_v54 = vld [vmem:[#allocation7 + $0xa4] ss:$8 sps:$4 sm:$0xff]   ;;  %v734_v56 = vld [vmem:[#allocation7 + $0xa0] ss:$8 sps:$4 sm:$0xff]   ;;  %v735_v57 = vld [vmem:[#allocation7 + $0xb4] ss:$8 sps:$4 sm:$0xff]  }
  0x49   :  { %282 = vmatprep.subr.bf16.mxu0 %v667_v10  ;;  %528 = vmatpush1.bf16.msra.mxu1 %v713_v29  ;;  %v737_v58 = vld [vmem:[#allocation7 + $0xb0] ss:$8 sps:$4 sm:$0xff]   ;;  %v738_v59 = vld [vmem:[#allocation7 + $0xc4] ss:$8 sps:$4 sm:$0xff]   ;;  %v740_v60 = vld [vmem:[#allocation7 + $0xc0] ss:$8 sps:$4 sm:$0xff]  }
  0x4a   :  { %529 = vmatprep.subr.bf16.mxu1 %v714_v30  ;;  %v741_v61 = vld [vmem:[#allocation7 + $0xd4] ss:$8 sps:$4 sm:$0xff]   ;;  %v743_v62 = vld [vmem:[#allocation7 + $0xd0] ss:$8 sps:$4 sm:$0xff]   ;;  %v744_v63 = vld [vmem:[#allocation7 + $0xe4] ss:$8 sps:$4 sm:$0xff]  }
  0x4b   :  { %v746_v0 = vld [vmem:[#allocation7 + $0xe0] ss:$8 sps:$4 sm:$0xff]   ;;  %v747_v1 = vld [vmem:[#allocation7 + $0xf4] ss:$8 sps:$4 sm:$0xff]   ;;  %v749_v2 = vld [vmem:[#allocation7 + $0xf0] ss:$8 sps:$4 sm:$0xff]  }
  0x4c   :  { %283 = vmatpush1.bf16.msra.mxu0 %v669_v11  ;;  %v96_v4 = vshrl.u32 %v95_v3, 7  ;;  %v93_v6 = vld [vmem:[%s948_s2] sm:$0x3]  ;;  %s849_s2 = smov [#allocation8]  }
  0x4d   :  { %284 = vmatprep.subr.bf16.mxu0 %v670_v12  ;;  %530 = vmatpush1.bf16.msra.mxu1 %v716_v33  ;;  %s570_s7 = sshll.u32 %s849_s2, 4  ;;  %s571_s7 = int_to_ptr.vmem [resolvable:$true] %s570_s7 }
  0x4e   :  { %531 = vmatprep.subr.bf16.mxu1 %v717_v34  ;;  %v97_v5 = vsub.s32 0, %v96_v4  ;;  %v101_v7 = vsub.s32 1, %v96_v4  ;;  %s816_s8 = scalar_lea.vmem %s571_s7, 256  ;;  %p821_p11 = scmp.lt.s32.totalorder %s571_s7, %s571_s7 }
  0x4f   :  { %p817_p10 = scmp.ne.s32.totalorder %s571_s7, %s816_s8  ;;  %p822_p12 = scmp.lt.s32.totalorder %s816_s8, %s816_s8 }
  0x50   :  { %285 = vmatpush1.bf16.msra.mxu0 %v672_v13  ;;  %v98_v8 = vrot.slane %v93_v6, %v97_v5  ;;  %v102_v9 = vrot.slane %v93_v6, %v101_v7 }
  0x51   :  { %286 = vmatprep.subr.bf16.mxu0 %v673_v19  ;;  %532 = vmatpush1.bf16.msra.mxu1 %v719_v36  ;;  %p823_p13 = por %p822_p12, %p821_p11 }
  0x52   :  { %533 = vmatprep.subr.bf16.mxu1 %v720_v38 }
  0x53   :  { %p824_p0 = pnand %p823_p13, %p817_p10 }
  0x54   :  { %287 = vmatpush1.bf16.msra.mxu0 %v675_v20  ;;  %v349_v20 = vld [vmem:[%s950_s4] sm:$0x3] }
  0x55   :  { %288 = vmatprep.subr.bf16.mxu0 %v676_v23  ;;  %534 = vmatpush1.bf16.msra.mxu1 %v722_v40  ;;  %v354_v21 = vrot.slane %v349_v20, %v97_v5  ;;  %v358_v22 = vrot.slane %v349_v20, %v101_v7 }
  0x56   :  { %535 = vmatprep.subr.bf16.mxu1 %v723_v42 }
  0x58   :  { %289 = vmatpush1.bf16.msra.mxu0 %v678_v24 }
  0x59   :  { %290 = vmatprep.subr.bf16.mxu0 %v679_v27  ;;  %536 = vmatpush1.bf16.msra.mxu1 %v725_v44 }
  0x5a   :  { %537 = vmatprep.subr.bf16.mxu1 %v726_v46 }
  0x5c   :  { %291 = vmatpush1.bf16.msra.mxu0 %v681_v28 }
  0x5d   :  { %292 = vmatprep.subr.bf16.mxu0 %v682_v31  ;;  %538 = vmatpush1.bf16.msra.mxu1 %v728_v48 }
  0x5e   :  { %539 = vmatprep.subr.bf16.mxu1 %v729_v50 }
  0x60   :  { %293 = vmatpush1.bf16.msra.mxu0 %v684_v32 }
  0x61   :  { %294 = vmatprep.subr.bf16.mxu0 %v685_v35  ;;  %540 = vmatpush1.bf16.msra.mxu1 %v731_v52 }
  0x62   :  { %541 = vmatprep.subr.bf16.mxu1 %v732_v54 }
  0x64   :  { %295 = vmatpush1.bf16.msra.mxu0 %v687_v37 }
  0x65   :  { %296 = vmatprep.subr.bf16.mxu0 %v688_v39  ;;  %542 = vmatpush1.bf16.msra.mxu1 %v734_v56 }
  0x66   :  { %543 = vmatprep.subr.bf16.mxu1 %v735_v57 }
  0x68   :  { %297 = vmatpush1.bf16.msra.mxu0 %v690_v41 }
  0x69   :  { %298 = vmatprep.subr.bf16.mxu0 %v691_v43  ;;  %544 = vmatpush1.bf16.msra.mxu1 %v737_v58 }
  0x6a   :  { %545 = vmatprep.subr.bf16.mxu1 %v738_v59 }
  0x6c   :  { %299 = vmatpush1.bf16.msra.mxu0 %v693_v45 }
  0x6d   :  { %300 = vmatprep.subr.bf16.mxu0 %v694_v47  ;;  %546 = vmatpush1.bf16.msra.mxu1 %v740_v60 }
  0x6e   :  { %547 = vmatprep.subr.bf16.mxu1 %v741_v61 }
  0x70   :  { %301 = vmatpush1.bf16.msra.mxu0 %v696_v49 }
  0x71   :  { %302 = vmatprep.subr.bf16.mxu0 %v697_v51  ;;  %548 = vmatpush1.bf16.msra.mxu1 %v743_v62 }
  0x72   :  { %549 = vmatprep.subr.bf16.mxu1 %v744_v63 }
  0x74   :  { %303 = vmatpush1.bf16.msra.mxu0 %v699_v53 }
  0x75   :  { %550 = vmatpush1.bf16.msra.mxu1 %v746_v0 }
  0x76   :  { %551 = vmatprep.subr.bf16.mxu1 %v747_v1 }
  0x77   :  { %305 = vmatmul.mubr.bf16.vlgmr.msra.gmra.mrb[0].mxu0 %v580_v55 }
  0x79   :  { %552 = vmatpush1.bf16.msra.mxu1 %v749_v2 }
 0x14a   :  { %v306_v10 = vpop.f32.mrb[0].mxu0 }
 0x14b   :  { %v307_v11 = vadd.f32 %v306_v10, %v98_v8  ;;  %v308_v12 = vpop.f32.mrb[1].mxu0 }
 0x14c   :  { %v309_v13 = vadd.f32 %v308_v12, %v102_v9  ;;  %v310_v14 = vpop.f32.mrb[2].mxu0 }
 0x14d   :  { %v313_v15 = vmax.f32 %v307_v11, 0.0  ;;  %v311_v16 = vpop.f32.mrb[3].mxu0 }
 0x14e   :  { %v314_v17 = vmax.f32 %v309_v13, 0.0 }
 0x14f   :  { %v315_v19 = vpack.c.bf16 %v313_v15, %v313_v15 }
 0x150   :  { %v316_v18 = vpack.c.bf16 %v314_v17, %v314_v17 }
 0x152   :  { %553 = vmatprep.mubr.bf16.mxu1 %v316_v18 }
 0x153   :  { %554 = vmatmul.mubr.bf16.vlgmr.msra.gmra.mrb[0].mxu1 %v315_v19 }
 0x226   :  { %v555_v23 = vpop.f32.mrb[0].mxu1 }
 0x227   :  { %v556_v24 = vadd.f32 %v555_v23, %v354_v21  ;;  %v557_v25 = vpop.f32.mrb[1].mxu1 }
 0x228   :  { %v558_v26 = vadd.f32 %v557_v25, %v358_v22  ;;  %v559_v27 = vpop.f32.mrb[2].mxu1 }
 0x229   :  { %562 = vst [vmem:[#allocation8] sm:$0xff] %v556_v24  ;;  %v560_v28 = vpop.f32.mrb[3].mxu1 }
 0x22a   :  { %563 = vst [vmem:[#allocation8 + $0x8] sm:$0xff] %v558_v26 }
 0x22b   :  { %827 = shalt.err (!%p824_p0)
}
 0x22c   :  { %s828_s10 = scalar_lea.hbm %s951_s5, 256 }
 0x22d   :  { %p829_p1 = scmp.ne.s32.totalorder %s951_s5, %s828_s10  ;;  %p832_p2 = scmp.lt.u32.totalorder %s828_s10, %s951_s5 }
 0x22f   :  { %p834_p3 = pnand %p832_p2, %p829_p1 }
 0x231   :  { %837 = shalt.err (!%p834_p3)
}
 0x232   :  { %573 = dma.vmem_to_hbm [thread:$0]  %s571_s7, 256, %s951_s5, [#allocation4]  }
 0x233   :  { %842 = dma.done.wait [#allocation4], 256  }
 0x234   :  { %843 = vsyncadd [#allocation4], 4294967040 }
 0x235   :  { %577 = vsyncpa [#allocation3], 1 }
 0x236   :  { %578 = vsyncpa [#allocation6], 1 }
 0x237   :  { %579 = vsyncpa [#allocation4], 1 }

</bundles_post_ra>
